<compile_context>
chip_gen: v6e
topology: v6e:2x2x1
jax: 0.10.0
libtpu: 0.0.40
codegen_flags: <defaults>
</compile_context>

<pallas_src>
import jax
import jax.numpy as jnp
from jax.experimental import pallas as pl
from jax.experimental.pallas import tpu as pltpu


def _hbm_copy_kernel(x_hbm, o_hbm, sem):
    # Whole-array HBM->HBM DMA: a pure memcpy of the (reshaped) input.
    cp = pltpu.make_async_copy(x_hbm, o_hbm, sem)
    cp.start()
    cp.wait()


@jax.jit
def model_forward(x1):
    """Mirrors Model.forward: returns x1.reshape(B, C, 28, 28)."""
    B, C = x1.shape[0], x1.shape[1]
    assert x1.size == B * C * 28 * 28, "input must reshape to (B, C, 28, 28)"

    # TODO(synk): the BatchNorm2d(1) branch of the original forward operates on
    # a non-constructible shape (B, C*3, 28, 28) and its result is discarded;
    # it is intentionally omitted (dead code, no observable effect).

    x2 = x1.reshape(B, C, 28, 28)  # metadata-only reshape

    out = pl.pallas_call(
        _hbm_copy_kernel,
        out_shape=jax.ShapeDtypeStruct((B, C, 28, 28), x1.dtype),
        in_specs=[pl.BlockSpec(memory_space=pl.ANY)],
        out_specs=pl.BlockSpec(memory_space=pl.ANY),
        scratch_shapes=[pltpu.SemaphoreType.DMA],
    )(x2)

    return out


if __name__ == "__main__":
    key = jax.random.PRNGKey(0)
    B, C = 2, 3
    x1 = jax.random.normal(key, (B, C, 28, 28), dtype=jnp.float32)

    out = model_forward(x1)
    jax.block_until_ready(out)

    assert out.shape == (B, C, 28, 28)
    # Returned value must equal x1 reshaped (identity copy here).
    assert jnp.allclose(out, x1.reshape(B, C, 28, 28))
    print("KERNEL_OK")
</pallas_src>

<mosaic_0001>
module attributes {stable_mosaic.version = 11 : i64} {
  func.func @_hbm_copy_kernel(%arg0: memref<2x3x28x28xf32, #tpu.memory_space<any>>, %arg1: memref<2x3x28x28xf32, #tpu.memory_space<any>>, %arg2: memref<!tpu.dma_semaphore, #tpu.memory_space<semaphore_mem>>) attributes {dimension_semantics = [], scalar_prefetch = 0 : i64, scratch_operands = 1 : i64, tpu.core_type = #tpu.core_type<tc>} {
    tpu.enqueue_dma source(%arg0 : memref<2x3x28x28xf32, #tpu.memory_space<any>>) target(%arg1 : memref<2x3x28x28xf32, #tpu.memory_space<any>>) target_semaphore(%arg2 : memref<!tpu.dma_semaphore, #tpu.memory_space<semaphore_mem>>)
    tpu.wait_dma2 semaphore(%arg2 : memref<!tpu.dma_semaphore, #tpu.memory_space<semaphore_mem>>) src(%arg0 : memref<2x3x28x28xf32, #tpu.memory_space<any>>) dst(%arg1 : memref<2x3x28x28xf32, #tpu.memory_space<any>>)
    return
  }
}

</mosaic_0001>

<bundles_post_ra>
// kernel: model_forward.1
= control target key start
LH: loop header
LB: loop body
LE: loop exit
PB: predicated region body
PF: predicated region fallthrough
CT: control target
= control target key end

     0   :  { %s310_s0 = inlined_call_operand.vmem [shape: f32[2,3,28,28], index: 0, kind: input, shape index: {}]   ;;  %s311_s1 = inlined_call_operand.vmem [shape: f32[2,3,28,28], index: 1, kind: output, shape index: {}]  }
   0x1   :  { %v54_v0 = vld [vmem:[%s310_s0] sm:$0xff]  ;;  %v56_v1 = vld [vmem:[%s310_s0 + $0x8] sm:$0xff]  ;;  %v58_v2 = vld [vmem:[%s310_s0 + $0x10] sm:$0xff] }
   0x2   :  { %55 = vst [vmem:[%s311_s1] sm:$0xff] %v54_v0  ;;  %57 = vst [vmem:[%s311_s1 + $0x8] sm:$0xff] %v56_v1  ;;  %v60_v3 = vld [vmem:[%s310_s0 + $0x20] sm:$0xff]  ;;  %v62_v4 = vld [vmem:[%s310_s0 + $0x28] sm:$0xff] }
   0x3   :  { %59 = vst [vmem:[%s311_s1 + $0x10] sm:$0xff] %v58_v2  ;;  %v64_v5 = vld [vmem:[%s310_s0 + $0x30] sm:$0xff]  ;;  %61 = vst [vmem:[%s311_s1 + $0x20] sm:$0xff] %v60_v3  ;;  %v66_v6 = vld [vmem:[%s310_s0 + $0x40] sm:$0xff] }
   0x4   :  { %63 = vst [vmem:[%s311_s1 + $0x28] sm:$0xff] %v62_v4  ;;  %65 = vst [vmem:[%s311_s1 + $0x30] sm:$0xff] %v64_v5  ;;  %v68_v7 = vld [vmem:[%s310_s0 + $0x48] sm:$0xff]  ;;  %v70_v8 = vld [vmem:[%s310_s0 + $0x50] sm:$0xff] }
   0x5   :  { %67 = vst [vmem:[%s311_s1 + $0x40] sm:$0xff] %v66_v6  ;;  %69 = vst [vmem:[%s311_s1 + $0x48] sm:$0xff] %v68_v7  ;;  %v72_v9 = vld [vmem:[%s310_s0 + $0x60] sm:$0xff]  ;;  %v74_v10 = vld [vmem:[%s310_s0 + $0x68] sm:$0xff] }
   0x6   :  { %71 = vst [vmem:[%s311_s1 + $0x50] sm:$0xff] %v70_v8  ;;  %v76_v11 = vld [vmem:[%s310_s0 + $0x70] sm:$0xff]  ;;  %73 = vst [vmem:[%s311_s1 + $0x60] sm:$0xff] %v72_v9  ;;  %v78_v12 = vld [vmem:[%s310_s0 + $0x80] sm:$0xff] }
   0x7   :  { %75 = vst [vmem:[%s311_s1 + $0x68] sm:$0xff] %v74_v10  ;;  %77 = vst [vmem:[%s311_s1 + $0x70] sm:$0xff] %v76_v11  ;;  %v80_v13 = vld [vmem:[%s310_s0 + $0x88] sm:$0xff]  ;;  %v82_v14 = vld [vmem:[%s310_s0 + $0x90] sm:$0xff] }
   0x8   :  { %79 = vst [vmem:[%s311_s1 + $0x80] sm:$0xff] %v78_v12  ;;  %81 = vst [vmem:[%s311_s1 + $0x88] sm:$0xff] %v80_v13  ;;  %v84_v15 = vld [vmem:[%s310_s0 + $0xa0] sm:$0xff]  ;;  %v86_v16 = vld [vmem:[%s310_s0 + $0xa8] sm:$0xff] }
   0x9   :  { %83 = vst [vmem:[%s311_s1 + $0x90] sm:$0xff] %v82_v14  ;;  %v88_v17 = vld [vmem:[%s310_s0 + $0xb0] sm:$0xff]  ;;  %85 = vst [vmem:[%s311_s1 + $0xa0] sm:$0xff] %v84_v15  ;;  %v141_v18 = vld [vmem:[%s310_s0 + $0x18] sm:$0xf] }
   0xa   :  { %87 = vst [vmem:[%s311_s1 + $0xa8] sm:$0xff] %v86_v16  ;;  %89 = vst [vmem:[%s311_s1 + $0xb0] sm:$0xff] %v88_v17  ;;  %v143_v19 = vld [vmem:[%s310_s0 + $0x38] sm:$0xf] }
   0xb   :  { %v145_v20 = vld [vmem:[%s310_s0 + $0x58] sm:$0xf]  ;;  %142 = vst [vmem:[%s311_s1 + $0x18] sm:$0xf] %v141_v18  ;;  %144 = vst [vmem:[%s311_s1 + $0x38] sm:$0xf] %v143_v19 }
   0xc   :  { %146 = vst [vmem:[%s311_s1 + $0x58] sm:$0xf] %v145_v20  ;;  %v147_v21 = vld [vmem:[%s310_s0 + $0x78] sm:$0xf] }
   0xd   :  { %v149_v22 = vld [vmem:[%s310_s0 + $0x98] sm:$0xf]  ;;  %148 = vst [vmem:[%s311_s1 + $0x78] sm:$0xf] %v147_v21 }
   0xe   :  { %v151_v23 = vld [vmem:[%s310_s0 + $0xb8] sm:$0xf]  ;;  %150 = vst [vmem:[%s311_s1 + $0x98] sm:$0xf] %v149_v22 }
   0xf   :  { %152 = vst [vmem:[%s311_s1 + $0xb8] sm:$0xf] %v151_v23 }
  0x10   :  { %115 = vsyncadd [#allocation2], 2688 }
  0x11   :  { %154 = dma.done.wait [#allocation2], 2688 }
  0x12   :  { %155 = vsyncadd [#allocation2], 4294964608 }
  0x13   :  { %121 = vsyncmov [#allocation2] }
  0x16   :  { %s122_s15 = vpop.sfrf %121 }
  0x17   :  { %p153_p0 = scmp.ne.s32.totalorder %s122_s15, 0 }
  0x19   :  { %126 = shalt.err (%p153_p0)  }

</bundles_post_ra>
